<compile_context>
chip_gen: v5e
topology: v5e:2x2
jax: 0.10.0
libtpu: 0.0.40
codegen_flags: <defaults>
</compile_context>

<pallas_src>
import math

import jax
import jax.numpy as jnp
from jax.experimental import pallas as pl
from jax.experimental.pallas import tpu as pltpu

_LN_EPS = 1e-5  # torch.nn.LayerNorm default eps


def _hardswish(x):
    # torch.nn.Hardswish: x * relu6(x + 3) / 6
    return x * jnp.clip(x + 3.0, 0.0, 6.0) * (1.0 / 6.0)


# ---------------------------------------------------------------------------
# Fused kernel: LayerNorm (precomputed stats) -> TriU -> Hardswish -> TriU
#   x_ref    : (C, TN)  activations, columns = fused (b, t)
#   stat_ref : (2, TN)  row 0 = per-batch mean, row 1 = per-batch rstd
#   gam/bet  : (C, TN)  LayerNorm affine, pre-tiled with period T along lanes
#   m1t_ref  : (T, C)   first TriU  (transposed causal matrix)
#   m2t_ref  : (T, T)   second TriU (transposed causal matrix)
#   b1/b2    : (T, 1)   biases
#   o_ref    : (T, TN)
# ---------------------------------------------------------------------------
def mixer_kernel(x_ref, stat_ref, gam_ref, bet_ref,
                 m1t_ref, b1_ref, m2t_ref, b2_ref, o_ref):
    z = x_ref[...]                                                     # (C, TN)
    mu = stat_ref[0:1, :]                                              # (1, TN)
    rstd = stat_ref[1:2, :]                                            # (1, TN)

    # LayerNorm([T, C]) with wrapper-precomputed per-batch stats (pure VPU).
    zn = (z - mu) * rstd * gam_ref[...] + bet_ref[...]                 # (C, TN)

    # TriU -> Hardswish -> TriU (tiny MXU matmuls, hidden under memory bound).
    h = jnp.dot(m1t_ref[...], zn,
                preferred_element_type=jnp.float32) + b1_ref[...]      # (T, TN)
    a = _hardswish(h)
    y = jnp.dot(m2t_ref[...], a,
                preferred_element_type=jnp.float32) + b2_ref[...]      # (T, TN)
    o_ref[...] = y.astype(o_ref.dtype)


# ---------------------------------------------------------------------------
# Wrapper: stats + layout plumbing + tiled pallas_call.
# ---------------------------------------------------------------------------
def multi_scale_time_mixer(x, gamma, beta, m1, b1, m2, b2, *, tn_max=8192):
    """scale_count=1 forward.

    x:     (B, C, T) float32      (module input, channels-first / time-last)
    gamma: (T, C), beta: (T, C)   LayerNorm([T, C]) affine
    m1:    (C, T), b1: (T,)       first TriU packed causal matrix + bias
    m2:    (T, T), b2: (T,)       second TriU packed causal matrix + bias
    returns (B, T, T)             (same as the PyTorch module)

    tn_max: max lane-tile width in columns; sweep ~4096-16384 per generation
            (v5e ~4-8K, v7x ~16K). Streamed bytes/step = (C+T+2)*tn*4.
    """
    B, C, T = x.shape
    N = B * T

    # ---- per-batch LayerNorm stats, f32, two-pass (wrapper side, cheap) ----
    xf = x.astype(jnp.float32)
    mu_b = jnp.mean(xf, axis=(1, 2))                                   # (B,)
    var_b = jnp.mean((xf - mu_b[:, None, None]) ** 2, axis=(1, 2))     # biased
    rstd_b = jax.lax.rsqrt(var_b + _LN_EPS)                            # (B,)
    stats = jnp.stack([jnp.repeat(mu_b, T), jnp.repeat(rstd_b, T)], 0)  # (2, N)

    # lane-major layout: columns are the fused (b, t) axis, rows are channels
    x_cn = jnp.transpose(x, (1, 0, 2)).reshape(C, N)

    # ---- lane tile sizing --------------------------------------------------
    # tn must be a multiple of T (tile-aligned batch groups) and of 128
    # (lane-dense). Keep >= 2 grid tiles whenever possible (v7x megacore),
    # otherwise maximise per-tile size up to tn_max.
    step = (T * 128) // math.gcd(T, 128)              # lcm(T, 128)
    units = -(-N // step)                             # ceil(N / step)
    max_units = max(1, tn_max // step)
    if units >= 2:
        units_per_tile = max(1, min(max_units, units // 2))
    else:
        units_per_tile = 1
    tn = units_per_tile * step
    n_pad = -(-units // units_per_tile) * tn
    if n_pad != N:
        # Padded columns: x = 0, mu = 0, rstd = 0  ->  zn = beta (finite).
        # Their outputs are discarded after the call; never reuse them.
        x_cn = jnp.pad(x_cn, ((0, 0), (0, n_pad - N)))
        stats = jnp.pad(stats, ((0, 0), (0, n_pad - N)))

    # LayerNorm affine, laid out per tile column (period T along lanes).
    reps = tn // T
    gamma_tile = jnp.tile(gamma.T.astype(jnp.float32), (1, reps))      # (C, TN)
    beta_tile = jnp.tile(beta.T.astype(jnp.float32), (1, reps))        # (C, TN)

    m1t = m1.T                        # (T, C)
    m2t = m2.T                        # (T, T)
    b1c = b1.reshape(T, 1)
    b2c = b2.reshape(T, 1)

    # ---- VMEM budget from actual block sizes (v7x-safe, 64 MiB physical) ---
    bytes_stream = (C + 2 + T) * tn * 4                      # x + stats + out
    bytes_resident = (2 * C * tn + T * C + T * T + 2 * T) * 4
    vmem_limit = int(min(48 * 1024 * 1024,
                         max(16 * 1024 * 1024,
                             4 * (bytes_stream + bytes_resident))))

    grid = (n_pad // tn,)
    out_cn = pl.pallas_call(
        mixer_kernel,
        out_shape=jax.ShapeDtypeStruct((T, n_pad), x.dtype),
        grid=grid,
        in_specs=[
            pl.BlockSpec((C, tn), lambda i: (0, i)),      # activations (tiled over N)
            pl.BlockSpec((2, tn), lambda i: (0, i)),      # per-column mu / rstd (tiled)
            pl.BlockSpec((C, tn), lambda i: (0, 0)),      # gamma tile (resident)
            pl.BlockSpec((C, tn), lambda i: (0, 0)),      # beta tile  (resident)
            pl.BlockSpec((T, C), lambda i: (0, 0)),       # M1^T       (resident)
            pl.BlockSpec((T, 1), lambda i: (0, 0)),       # b1         (resident)
            pl.BlockSpec((T, T), lambda i: (0, 0)),       # M2^T       (resident)
            pl.BlockSpec((T, 1), lambda i: (0, 0)),       # b2         (resident)
        ],
        out_specs=pl.BlockSpec((T, tn), lambda i: (0, i)),
        compiler_params=pltpu.CompilerParams(
            dimension_semantics=("parallel",),            # megacore over N tiles
            vmem_limit_bytes=vmem_limit,
        ),
    )(x_cn, stats, gamma_tile, beta_tile, m1t, b1c, m2t, b2c)

    # (T, N) -> (B, T_rows, T_out), matching the PyTorch module output.
    y = out_cn[:, :N].reshape(T, B, T)
    return jnp.transpose(y, (1, 2, 0))


# ---------------------------------------------------------------------------
# Parameter setup (glue, plain JAX): pack a TriU(time_step) (nn.Linear(i+1,1)
# stack, applied over an input last-dim of size in_dim >= time_step) into a
# (in_dim, time_step) causal matrix + (time_step,) bias, with nn.Linear-style
# U(-1/sqrt(fan_in), 1/sqrt(fan_in)) init.
# ---------------------------------------------------------------------------
def init_triu_params(key, in_dim, time_step, dtype=jnp.float32):
    M = jnp.zeros((in_dim, time_step), dtype)
    b = jnp.zeros((time_step,), dtype)
    for i in range(time_step):
        key, wk, bk = jax.random.split(key, 3)
        fan_in = i + 1
        bound = 1.0 / (fan_in ** 0.5)
        w = jax.random.uniform(wk, (fan_in,), dtype, -bound, bound)
        bi = jax.random.uniform(bk, (), dtype, -bound, bound)
        M = M.at[:fan_in, i].set(w)       # column i mixes inputs 0..i (causal)
        b = b.at[i].set(bi)
    return M, b, key


# Pure-JAX reference of the literal PyTorch forward (scale_count=1).
def ref_forward(x, gamma, beta, m1, b1, m2, b2, eps=_LN_EPS):
    xp = jnp.transpose(x, (0, 2, 1))                                   # (B, T, C)
    mu = jnp.mean(xp, axis=(1, 2), keepdims=True)                      # LayerNorm([T, C])
    var = jnp.mean((xp - mu) ** 2, axis=(1, 2), keepdims=True)
    z = (xp - mu) * jax.lax.rsqrt(var + eps) * gamma + beta
    h = jnp.einsum("btc,cj->btj", z, m1) + b1                          # TriU
    a = h * jnp.clip(h + 3.0, 0.0, 6.0) / 6.0                          # Hardswish
    return jnp.einsum("bti,ij->btj", a, m2) + b2                       # TriU


if __name__ == "__main__":
    key = jax.random.PRNGKey(0)

    def make_case(key, B, C, T):
        key, xk, gk, bk = jax.random.split(key, 4)
        x = jax.random.normal(xk, (B, C, T), jnp.float32)
        gamma = 1.0 + 0.1 * jax.random.normal(gk, (T, C), jnp.float32)
        beta = 0.1 * jax.random.normal(bk, (T, C), jnp.float32)
        m1, b1, key = init_triu_params(key, C, T)
        m2, b2, key = init_triu_params(key, T, T)
        return key, (x, gamma, beta, m1, b1, m2, b2)

    # Small canonical case: time_step = channel = 8, single lane tile.
    key, args = make_case(key, B=4, C=8, T=8)
    out = jax.block_until_ready(multi_scale_time_mixer(*args))
    ref = ref_forward(*args)
    assert out.shape == (4, 8, 8)
    assert jnp.allclose(out, ref, atol=2e-5, rtol=2e-5), (
        "mismatch", float(jnp.max(jnp.abs(out - ref))))

    # Case exercising the tiled, padded, multi-step grid with C > T
    # (N = 160, lane tile 128 -> grid=(2,), 96 padded columns).
    key, args = make_case(key, B=20, C=16, T=8)
    out = jax.block_until_ready(multi_scale_time_mixer(*args, tn_max=128))
    ref = ref_forward(*args)
    assert out.shape == (20, 8, 8)
    assert jnp.allclose(out, ref, atol=2e-5, rtol=2e-5), (
        "mismatch", float(jnp.max(jnp.abs(out - ref))))

    # Case exercising multi-unit lane tiles with no padding
    # (N = 768, tn = 384 -> grid=(2,)).
    key, args = make_case(key, B=96, C=8, T=8)
    out = jax.block_until_ready(multi_scale_time_mixer(*args))
    ref = ref_forward(*args)
    assert out.shape == (96, 8, 8)
    assert jnp.allclose(out, ref, atol=2e-5, rtol=2e-5), (
        "mismatch", float(jnp.max(jnp.abs(out - ref))))

    print("KERNEL_OK")
</pallas_src>

<mosaic_0001>
module attributes {stable_mosaic.version = 11 : i64} {
  func.func @mixer_kernel(%arg0: i32, %arg1: memref<8x128xf32, #tpu.memory_space<vmem>>, %arg2: memref<2x128xf32, #tpu.memory_space<vmem>>, %arg3: memref<8x128xf32, #tpu.memory_space<vmem>>, %arg4: memref<8x128xf32, #tpu.memory_space<vmem>>, %arg5: memref<8x8xf32, #tpu.memory_space<vmem>>, %arg6: memref<8x1xf32, #tpu.memory_space<vmem>>, %arg7: memref<8x8xf32, #tpu.memory_space<vmem>>, %arg8: memref<8x1xf32, #tpu.memory_space<vmem>>, %arg9: memref<8x128xf32, #tpu.memory_space<vmem>>) attributes {dimension_semantics = [#tpu.dimension_semantics<parallel>], iteration_bounds = array<i64: 1>, scalar_prefetch = 0 : i64, scratch_operands = 0 : i64, tpu.core_type = #tpu.core_type<tc>, window_params = [{transform_indices = @transform_0, window_bounds = array<i64: 8, 128>}, {transform_indices = @transform_1, window_bounds = array<i64: 2, 128>}, {pipeline_mode = #tpu.pipeline_mode<synchronous>, transform_indices = @transform_2, window_bounds = array<i64: 8, 128>}, {pipeline_mode = #tpu.pipeline_mode<synchronous>, transform_indices = @transform_3, window_bounds = array<i64: 8, 128>}, {pipeline_mode = #tpu.pipeline_mode<synchronous>, transform_indices = @transform_4, window_bounds = array<i64: 8, 8>}, {pipeline_mode = #tpu.pipeline_mode<synchronous>, transform_indices = @transform_5, window_bounds = array<i64: 8, 1>}, {pipeline_mode = #tpu.pipeline_mode<synchronous>, transform_indices = @transform_6, window_bounds = array<i64: 8, 8>}, {pipeline_mode = #tpu.pipeline_mode<synchronous>, transform_indices = @transform_7, window_bounds = array<i64: 8, 1>}, {transform_indices = @transform_8, window_bounds = array<i64: 8, 128>}]} {
    %c0 = arith.constant 0 : index
    %c0_0 = arith.constant 0 : index
    %0 = vector.load %arg1[%c0, %c0_0] : memref<8x128xf32, #tpu.memory_space<vmem>>, vector<8x128xf32>
    %c0_1 = arith.constant 0 : index
    %c0_2 = arith.constant 0 : index
    %1 = vector.load %arg2[%c0_1, %c0_2] : memref<2x128xf32, #tpu.memory_space<vmem>>, vector<1x128xf32>
    %c1 = arith.constant 1 : index
    %c0_3 = arith.constant 0 : index
    %2 = vector.load %arg2[%c1, %c0_3] : memref<2x128xf32, #tpu.memory_space<vmem>>, vector<1x128xf32>
    %3 = vector.broadcast %1 : vector<1x128xf32> to vector<8x128xf32>
    %4 = arith.subf %0, %3 : vector<8x128xf32>
    %5 = vector.broadcast %2 : vector<1x128xf32> to vector<8x128xf32>
    %6 = arith.mulf %4, %5 : vector<8x128xf32>
    %c0_4 = arith.constant 0 : index
    %c0_5 = arith.constant 0 : index
    %7 = vector.load %arg3[%c0_4, %c0_5] : memref<8x128xf32, #tpu.memory_space<vmem>>, vector<8x128xf32>
    %8 = arith.mulf %6, %7 : vector<8x128xf32>
    %c0_6 = arith.constant 0 : index
    %c0_7 = arith.constant 0 : index
    %9 = vector.load %arg4[%c0_6, %c0_7] : memref<8x128xf32, #tpu.memory_space<vmem>>, vector<8x128xf32>
    %10 = arith.addf %8, %9 : vector<8x128xf32>
    %c0_8 = arith.constant 0 : index
    %c0_9 = arith.constant 0 : index
    %11 = vector.load %arg5[%c0_8, %c0_9] : memref<8x8xf32, #tpu.memory_space<vmem>>, vector<8x8xf32>
    %cst = arith.constant dense<0.000000e+00> : vector<8x128xf32>
    %12 = tpu.matmul %11, %10, %cst {dimension_numbers = #tpu.dot_dimension_numbers<[1], [0], [0], [1], [0, 0, 1, 1], [], []>} : vector<8x8xf32>, vector<8x128xf32>, vector<8x128xf32> -> vector<8x128xf32>
    %c0_10 = arith.constant 0 : index
    %c0_11 = arith.constant 0 : index
    %13 = vector.load %arg6[%c0_10, %c0_11] : memref<8x1xf32, #tpu.memory_space<vmem>>, vector<8x1xf32>
    %14 = vector.broadcast %13 : vector<8x1xf32> to vector<8x128xf32>
    %15 = arith.addf %12, %14 : vector<8x128xf32>
    %cst_12 = arith.constant 3.000000e+00 : f32
    %16 = vector.broadcast %cst_12 : f32 to vector<8x128xf32>
    %17 = arith.addf %15, %16 : vector<8x128xf32>
    %cst_13 = arith.constant 0.000000e+00 : f32
    %cst_14 = arith.constant 6.000000e+00 : f32
    %18 = vector.broadcast %cst_13 : f32 to vector<8x128xf32>
    %19 = arith.maximumf %18, %17 : vector<8x128xf32>
    %20 = vector.broadcast %cst_14 : f32 to vector<8x128xf32>
    %21 = arith.minimumf %20, %19 : vector<8x128xf32>
    %22 = arith.mulf %15, %21 : vector<8x128xf32>
    %cst_15 = arith.constant 0.166666672 : f32
    %23 = vector.broadcast %cst_15 : f32 to vector<8x128xf32>
    %24 = arith.mulf %22, %23 : vector<8x128xf32>
    %c0_16 = arith.constant 0 : index
    %c0_17 = arith.constant 0 : index
    %25 = vector.load %arg7[%c0_16, %c0_17] : memref<8x8xf32, #tpu.memory_space<vmem>>, vector<8x8xf32>
    %cst_18 = arith.constant dense<0.000000e+00> : vector<8x128xf32>
    %26 = tpu.matmul %25, %24, %cst_18 {dimension_numbers = #tpu.dot_dimension_numbers<[1], [0], [0], [1], [0, 0, 1, 1], [], []>} : vector<8x8xf32>, vector<8x128xf32>, vector<8x128xf32> -> vector<8x128xf32>
    %c0_19 = arith.constant 0 : index
    %c0_20 = arith.constant 0 : index
    %27 = vector.load %arg8[%c0_19, %c0_20] : memref<8x1xf32, #tpu.memory_space<vmem>>, vector<8x1xf32>
    %28 = vector.broadcast %27 : vector<8x1xf32> to vector<8x128xf32>
    %29 = arith.addf %26, %28 : vector<8x128xf32>
    %c0_21 = arith.constant 0 : index
    %c0_22 = arith.constant 0 : index
    %30 = vector.load %arg9[%c0_21, %c0_22] : memref<8x128xf32, #tpu.memory_space<vmem>>, vector<8x128xf32>
    tpu.vector_store %arg9[%c0_21, %c0_22], %29 {strides = array<i32>} : memref<8x128xf32, #tpu.memory_space<vmem>>, vector<8x128xf32>,
    return
  }
  func.func @transform_0(%arg0: i32) -> (i32, i32) {
    %c0_i32 = arith.constant 0 : i32
    %c0_i32_0 = arith.constant 0 : i32
    return %c0_i32, %arg0 : i32, i32
  }
  func.func @transform_1(%arg0: i32) -> (i32, i32) {
    %c0_i32 = arith.constant 0 : i32
    %c0_i32_0 = arith.constant 0 : i32
    return %c0_i32, %arg0 : i32, i32
  }
  func.func @transform_2(%arg0: i32) -> (i32, i32) {
    %c0_i32 = arith.constant 0 : i32
    %c0_i32_0 = arith.constant 0 : i32
    %c0_i32_1 = arith.constant 0 : i32
    return %c0_i32, %c0_i32_0 : i32, i32
  }
  func.func @transform_3(%arg0: i32) -> (i32, i32) {
    %c0_i32 = arith.constant 0 : i32
    %c0_i32_0 = arith.constant 0 : i32
    %c0_i32_1 = arith.constant 0 : i32
    return %c0_i32, %c0_i32_0 : i32, i32
  }
  func.func @transform_4(%arg0: i32) -> (i32, i32) {
    %c0_i32 = arith.constant 0 : i32
    %c0_i32_0 = arith.constant 0 : i32
    %c0_i32_1 = arith.constant 0 : i32
    return %c0_i32, %c0_i32_0 : i32, i32
  }
  func.func @transform_5(%arg0: i32) -> (i32, i32) {
    %c0_i32 = arith.constant 0 : i32
    %c0_i32_0 = arith.constant 0 : i32
    %c0_i32_1 = arith.constant 0 : i32
    return %c0_i32, %c0_i32_0 : i32, i32
  }
  func.func @transform_6(%arg0: i32) -> (i32, i32) {
    %c0_i32 = arith.constant 0 : i32
    %c0_i32_0 = arith.constant 0 : i32
    %c0_i32_1 = arith.constant 0 : i32
    return %c0_i32, %c0_i32_0 : i32, i32
  }
  func.func @transform_7(%arg0: i32) -> (i32, i32) {
    %c0_i32 = arith.constant 0 : i32
    %c0_i32_0 = arith.constant 0 : i32
    %c0_i32_1 = arith.constant 0 : i32
    return %c0_i32, %c0_i32_0 : i32, i32
  }
  func.func @transform_8(%arg0: i32) -> (i32, i32) {
    %c0_i32 = arith.constant 0 : i32
    %c0_i32_0 = arith.constant 0 : i32
    return %c0_i32, %arg0 : i32, i32
  }
}

</mosaic_0001>

<bundles_post_ra>
// kernel: tpu_custom_call.1
= control target key start
LH: loop header
LB: loop body
LE: loop exit
PB: predicated region body
PF: predicated region fallthrough
CT: control target
= control target key end

     0   :  { %13 = vsyncpa [#allocation3], 0  ;;  %s399_s0 = inlined_call_operand.vmem [shape: f32[8,128], index: 0, kind: input, shape index: {}]   ;;  %s400_s1 = inlined_call_operand.hbm [shape: f32[2,128], index: 1, kind: input, shape index: {}]   ;;  %s401_s2 = inlined_call_operand.vmem [shape: f32[8,128], index: 2, kind: input, shape index: {}]   ;;  %s402_s3 = inlined_call_operand.hbm [shape: f32[8,128], index: 3, kind: input, shape index: {}]   ;;  %s403_s4 = inlined_call_operand.hbm [shape: f32[8,8], index: 4, kind: input, shape index: {}]   ;;  %s404_s5 = inlined_call_operand.vmem [shape: f32[8,1], index: 5, kind: input, shape index: {}]   ;;  %s405_s6 = inlined_call_operand.hbm [shape: f32[8,8], index: 6, kind: input, shape index: {}]   ;;  %s406_s7 = inlined_call_operand.vmem [shape: f32[8,1], index: 7, kind: input, shape index: {}]   ;;  %s407_s8 = inlined_call_operand.hbm [shape: f32[8,128], index: 8, kind: output, shape index: {}]  }
   0x1   :  { %14 = vsyncpa [#allocation6], 0 }
   0x2   :  { %15 = vsyncpa [#allocation9], 0  ;;  %s37_s29 = sshll.u32 %s402_s3, 4  ;;  %s38_s29 = int_to_ptr.hbm [resolvable:$true] %s37_s29 }
   0x3   :  { %16 = vsyncpa [#allocation4], 0  ;;  %s321_s30 = smov [#allocation5]   ;;  %s24_s12 = sshll.u32 %s400_s1, 4  ;;  %s25_s12 = int_to_ptr.hbm [resolvable:$true] %s24_s12 }
   0x4   :  { %s39_s9 = sshll.u32 %s321_s30, 4  ;;  %s322_s13 = smov [#allocation2]   ;;  %s40_s9 = int_to_ptr.vmem [resolvable:$true] %s39_s9 }
   0x5   :  { %42 = dma.hbm_to_vmem [thread:$0]  %s38_s29, 128, %s40_s9, [#allocation6]  }
   0x6   :  { %s26_s14 = sshll.u32 %s322_s13, 4  ;;  %s48_s17 = sshll.u32 %s403_s4, 4  ;;  %s27_s14 = int_to_ptr.vmem [resolvable:$true] %s26_s14  ;;  %s49_s17 = int_to_ptr.hbm [resolvable:$true] %s48_s17 }
   0x7   :  { %29 = dma.hbm_to_vmem [thread:$0]  %s25_s12, 32, %s27_s14, [#allocation3]  }
   0x8   :  { %s61_s19 = sshll.u32 %s405_s6, 4  ;;  %s323_s20 = smov [#allocation7]   ;;  %s62_s19 = int_to_ptr.hbm [resolvable:$true] %s61_s19 }
   0x9   :  { %s50_s21 = sshll.u32 %s323_s20, 4  ;;  %s324_s1 = smov [#allocation8]   ;;  %s51_s21 = int_to_ptr.vmem [resolvable:$true] %s50_s21 }
   0xa   :  { %53 = dma.hbm_to_vmem [thread:$0]  %s49_s17, 128, %s51_s21, [#allocation6]  }
   0xb   :  { %s63_s22 = sshll.u32 %s324_s1, 4  ;;  %s64_s22 = int_to_ptr.vmem [resolvable:$true] %s63_s22 }
   0xc   :  { %66 = dma.hbm_to_vmem [thread:$0]  %s62_s19, 128, %s64_s22, [#allocation9]  }
   0xd   :  { %313 = dma.done.wait [#allocation3], 32  }
   0xe   :  { %314 = vsyncadd [#allocation3], 4294967264 }
   0xf   :  { %315 = dma.done.wait [#allocation6], 256  }
  0x10   :  { %316 = vsyncadd [#allocation6], 4294967040 }
  0x11   :  { %317 = dma.done.wait [#allocation9], 128  }
  0x12   :  { %318 = vsyncadd [#allocation9], 4294967168  ;;  %v325_v0 = vmov 0   ;;  %v85_v1 = vld [vmem:[%s399_s0] sm:$0xff]  ;;  %v96_v12 = vld [vmem:[#allocation7] sm:$0xff]  ;;  %vm103_vm0 = vcmask 64512  }
  0x13   :  { %190 = vset.pattern.permute.xlu0 %v325_v0  ;;  %v191_v2 = vld [vmem:[#allocation2] ss:$0 sm:$0xff]  ;;  %v192_v3 = vld [vmem:[#allocation2 + $0x1] ss:$0 sm:$0xff]  ;;  %v94_v8 = vld [vmem:[#allocation5] sm:$0xff]  ;;  %s326_s0 = smov [#allocation10]  }
  0x14   :  { %v97_v4 = vld [vmem:[%s404_s5] sm:$0xff]  ;;  %v89_v5 = vsub.f32 %v85_v1, %v191_v2  ;;  %v132_v21 = vld [vmem:[#allocation8] sm:$0xff]  ;;  %s170_s29 = sshll.u32 %s407_s8, 4  ;;  %s171_s29 = int_to_ptr.hbm [resolvable:$true] %s170_s29 }
  0x15   :  { %100 = vperm.xlu0 %190, %v97_v4   ;;  %v92_v6 = vld [vmem:[%s401_s2] sm:$0xff]  ;;  %s168_s2 = sshll.u32 %s326_s0, 4  ;;  %s169_s2 = int_to_ptr.vmem [resolvable:$true] %s168_s2 }
  0x16   :  { %v91_v7 = vmul.f32 %v192_v3, %v89_v5  ;;  %v133_v10 = vld [vmem:[%s406_s7] sm:$0xff] }
  0x18   :  { %v93_v9 = vmul.f32 %v92_v6, %v91_v7 }
  0x1a   :  { %v95_v11 = vadd.f32 %v94_v8, %v93_v9 }
  0x1c   :  { %122 = vmatpush.msra.mxu0 %v95_v11 }
  0x1d   :  { %136 = vperm.xlu0 %190, %v133_v10   ;;  %182 = vmatmul.msk.f32.vlgmr.msra.gmra.mxu0 %vm103_vm0, %v96_v12 }
  0x87   :  { %v101_v13 = vpop.permute.xlu0 %100 }
  0x8f   :  { %v137_v22 = vpop.permute.xlu0 %136 }
  0x9a   :  { %v124_v14 = vpop.f32.mrf.mxu0 }
  0x9b   :  { %v125_v15 = vadd.f32 %v124_v14, %v101_v13 }
  0x9d   :  { %v127_v16 = vadd.f32 3.0, %v125_v15 }
  0x9f   :  { %v128_v17 = vmax.f32 %v127_v16, 0.0 }
  0xa1   :  { %v129_v18 = vmin.f32 %v128_v17, 6.0 }
  0xa3   :  { %v130_v19 = vmul.f32 %v129_v18, %v125_v15 }
  0xa5   :  { %v131_v20 = vmul.f32 0.16666667, %v130_v19 }
  0xa7   :  { %157 = vmatpush.msra.mxu1 %v131_v20 }
  0xa8   :  { %183 = vmatmul.msk.f32.vlgmr.msra.gmra.mxu1 %vm103_vm0, %v132_v21 }
 0x125   :  { %v159_v23 = vpop.f32.mrf.mxu1 }
 0x126   :  { %v160_v24 = vadd.f32 %v159_v23, %v137_v22 }
 0x128   :  { %162 = vst [vmem:[#allocation10] sm:$0xff] %v160_v24 }
 0x129   :  { %173 = dma.vmem_to_hbm [thread:$0]  %s169_s2, 128, %s171_s29, [#allocation4]  }
 0x12a   :  { %319 = dma.done.wait [#allocation4], 128  }
 0x12b   :  { %320 = vsyncadd [#allocation4], 4294967168 }
 0x12c   :  { %178 = vsyncpa [#allocation3], 1 }
 0x12d   :  { %179 = vsyncpa [#allocation6], 1 }
 0x12e   :  { %180 = vsyncpa [#allocation9], 1 }
 0x12f   :  { %181 = vsyncpa [#allocation4], 1 }

</bundles_post_ra>
